<compile_context>
chip_gen: v7x
topology: tpu7x:2x2x1
jax: 0.10.0
libtpu: 0.0.40
codegen_flags: <defaults>
</compile_context>

<pallas_src>
import functools
import math

import jax
import jax.numpy as jnp
from jax import lax
from jax.experimental import pallas as pl
from jax.experimental.pallas import tpu as pltpu


# ----------------------------------------------------------------------------
# pltpu.roll rotation-convention probe (tiny kernel, run once, cached).
# ----------------------------------------------------------------------------
_ROLL_LIKE_JNP = None


def _roll_like_jnp():
    """True iff pltpu.roll(x, s, a) == jnp.roll(x, s, a) on this backend."""
    global _ROLL_LIKE_JNP
    if _ROLL_LIKE_JNP is None:
        def probe(x_ref, o_ref):
            o_ref[...] = pltpu.roll(x_ref[...], 1, 1)
        x = jnp.arange(8 * 128, dtype=jnp.float32).reshape(8, 128)
        y = pl.pallas_call(
            probe, out_shape=jax.ShapeDtypeStruct((8, 128), jnp.float32))(x)
        _ROLL_LIKE_JNP = bool(jnp.allclose(y, jnp.roll(x, 1, axis=1)))
    return _ROLL_LIKE_JNP


# ----------------------------------------------------------------------------
# Generic 'same' Conv2d (stride=1) kernel, channel-major weight-stationary form.
# ----------------------------------------------------------------------------
def _conv_kernel(x_ref, w_ref, b_ref, m_ref, *rest, H, W, Cout, KH, KW,
                 dil, pad, relu, clamp, has_res, roll_like_jnp):
    if has_res:
        r_ref, o_ref = rest
    else:
        (o_ref,) = rest
    HW = H * W
    x = x_ref[0]                                           # (Cin, H*W), lane-dense load
    # Bias-initialized accumulator (single hoisted broadcast, no extra add).
    acc = jnp.broadcast_to(b_ref[...], (Cout, HW)).astype(jnp.float32)
    for kh in range(KH):
        for kw in range(KW):
            dh = kh * dil - pad
            dw = kw * dil - pad
            off = dh * W + dw
            if off == 0:
                src = x                                    # centre tap: no shift, no mask
            else:
                shift = (-off) % HW if roll_like_jnp else off % HW
                # src[:, p] == x[:, p + off] for every in-image p; wrap-around is masked.
                src = pltpu.roll(x, shift, 1)
                t = kh * KW + kw
                src = src * m_ref[t:t + 1, :]
            acc = acc + jnp.dot(w_ref[kh, kw], src,
                                preferred_element_type=jnp.float32)
    if relu:
        acc = jnp.maximum(acc, 0.0)
    if clamp is not None:
        acc = jnp.clip(acc, clamp[0], clamp[1])
    if has_res:
        acc = acc + r_ref[0]
    o_ref[0] = acc.astype(o_ref.dtype)


def conv2d_cm(x, w_oihw, b, *, H, W, padding, dilation=1, relu=False,
              clamp=None, residual=None):
    """'same' Conv2d(stride=1, PyTorch semantics) on channel-major x: (N, Cin, H*W)."""
    N, Cin, HW = x.shape
    Cout, Cin_w, KH, KW = w_oihw.shape
    assert HW == H * W and Cin_w == Cin
    # The shift-and-mask formulation requires a 'same' conv (true for every conv here).
    assert 2 * padding == dilation * (KH - 1) == dilation * (KW - 1)

    w_t = jnp.transpose(w_oihw, (2, 3, 0, 1)).astype(jnp.float32)   # (KH, KW, Cout, Cin)
    b_col = b.reshape(Cout, 1).astype(jnp.float32)

    # Per-tap in-image masks (KH*KW, H*W): 1.0 where the shifted source pixel exists.
    hh = jnp.arange(H)[:, None]
    ww = jnp.arange(W)[None, :]
    masks = []
    for kh in range(KH):
        for kw in range(KW):
            dh = kh * dilation - padding
            dw = kw * dilation - padding
            m = ((hh + dh >= 0) & (hh + dh < H) & (ww + dw >= 0) & (ww + dw < W))
            masks.append(m.reshape(HW))
    masks = jnp.stack(masks).astype(jnp.float32)

    inputs = [x, w_t, b_col, masks]
    in_specs = [
        pl.BlockSpec((1, Cin, HW), lambda n: (n, 0, 0)),
        pl.BlockSpec((KH, KW, Cout, Cin), lambda n: (0, 0, 0, 0)),
        pl.BlockSpec((Cout, 1), lambda n: (0, 0)),
        pl.BlockSpec((KH * KW, HW), lambda n: (0, 0)),
    ]
    has_res = residual is not None
    if has_res:
        inputs.append(residual)
        in_specs.append(pl.BlockSpec((1, Cout, HW), lambda n: (n, 0, 0)))

    kernel = functools.partial(
        _conv_kernel, H=H, W=W, Cout=Cout, KH=KH, KW=KW, dil=dilation,
        pad=padding, relu=relu, clamp=clamp, has_res=has_res,
        roll_like_jnp=_roll_like_jnp())

    return pl.pallas_call(
        kernel,
        out_shape=jax.ShapeDtypeStruct((N, Cout, HW), jnp.float32),
        grid_spec=pltpu.PrefetchScalarGridSpec(
            num_scalar_prefetch=0,
            grid=(N,),
            in_specs=in_specs,
            out_specs=pl.BlockSpec((1, Cout, HW), lambda n: (n, 0, 0)),
        ),
        compiler_params=pltpu.CompilerParams(dimension_semantics=("parallel",)),
    )(*inputs)


# ----------------------------------------------------------------------------
# ImplicitTrans: y = conv1x1(x * weight, dct_kernel * (table*factor + bias))
# ----------------------------------------------------------------------------
def _jpeg_table():
    return jnp.array([16, 16, 16, 16, 17, 18, 21, 24,
                      16, 16, 16, 16, 17, 19, 22, 25,
                      16, 16, 17, 18, 20, 22, 25, 29,
                      16, 16, 18, 21, 24, 27, 31, 36,
                      17, 17, 20, 24, 30, 35, 41, 47,
                      18, 19, 22, 27, 35, 44, 54, 65,
                      21, 22, 25, 31, 41, 54, 70, 88,
                      24, 25, 29, 36, 47, 65, 88, 115], dtype=jnp.float32) / 255.0


def _dct_kernel():
    """(64, 64) [out=(i,j), in=(u,v)] DCT basis used by ImplicitTrans."""
    i = jnp.arange(8, dtype=jnp.float32)
    u = jnp.arange(8, dtype=jnp.float32)
    cos = jnp.cos((2.0 * i[:, None] + 1.0) * u[None, :] * jnp.pi / 16.0)    # (i, u)
    scale = jnp.where(u == 0, jnp.sqrt(1.0 / 8.0), jnp.sqrt(2.0 / 8.0))
    a = cos * scale[None, :]
    return jnp.einsum('iu,jv->ijuv', a, a).reshape(64, 64)


def _implicit_kernel(x_ref, wv_ref, k_ref, o_ref):
    xw = x_ref[0] * wv_ref[0]                               # (C, H*W) * (C, 1)
    o_ref[0] = jnp.dot(k_ref[...], xw, preferred_element_type=jnp.float32)


def implicit_trans(x, wvec, factor, bias_p):
    N, C, HW = x.shape
    table_eff = _jpeg_table() * factor + bias_p             # (C,)
    k_eff = (_dct_kernel() * table_eff[:, None]).astype(jnp.float32)   # (Cout, Cin)
    wv = wvec.reshape(N, C, 1).astype(jnp.float32)
    return pl.pallas_call(
        _implicit_kernel,
        out_shape=jax.ShapeDtypeStruct((N, C, HW), jnp.float32),
        grid_spec=pltpu.PrefetchScalarGridSpec(
            num_scalar_prefetch=0,
            grid=(N,),
            in_specs=[pl.BlockSpec((1, C, HW), lambda n: (n, 0, 0)),
                      pl.BlockSpec((1, C, 1), lambda n: (n, 0, 0)),
                      pl.BlockSpec((C, C), lambda n: (0, 0))],
            out_specs=pl.BlockSpec((1, C, HW), lambda n: (n, 0, 0)),
        ),
        compiler_params=pltpu.CompilerParams(dimension_semantics=("parallel",)),
    )(x, wv, k_eff)


# ----------------------------------------------------------------------------
# GetWeight: stride-2 downsample conv + global avg pool + 4x (Linear, ReLU)
# ----------------------------------------------------------------------------
def _fc_kernel(y_ref, w1_ref, w2_ref, w3_ref, w4_ref, o_ref):
    h = jnp.maximum(jnp.dot(y_ref[...], w1_ref[...], preferred_element_type=jnp.float32), 0.0)
    h = jnp.maximum(jnp.dot(h, w2_ref[...], preferred_element_type=jnp.float32), 0.0)
    h = jnp.maximum(jnp.dot(h, w3_ref[...], preferred_element_type=jnp.float32), 0.0)
    o_ref[...] = jnp.maximum(jnp.dot(h, w4_ref[...], preferred_element_type=jnp.float32), 0.0)


def get_weight(t, gp, H, W):
    N, C, HW = t.shape
    # stride-2 conv == stride-1 'same' conv sampled at the even spatial positions
    z = conv2d_cm(t, gp['dw'], gp['db'], H=H, W=W, padding=1)
    z = z.reshape(N, C, H, W)[:, :, ::2, ::2]
    y = jnp.mean(z, axis=(2, 3))                            # AdaptiveAvgPool2d(1)
    return pl.pallas_call(
        _fc_kernel, out_shape=jax.ShapeDtypeStruct((N, C), jnp.float32),
    )(y, gp['w1'].T, gp['w2'].T, gp['w3'].T, gp['w4'].T)


# ----------------------------------------------------------------------------
# DualDomainBlock forward (Pallas) and pure-JAX reference.
# ----------------------------------------------------------------------------
def dual_domain_block(x_nchw, p, dilation_rates=(3, 2, 1)):
    N, C, H, W = x_nchw.shape
    d0, d1, d2 = dilation_rates
    x = x_nchw.reshape(N, C, H * W)          # channel-major, spatial in lanes (free reshape)

    # PyramidCell
    cat = x
    for name, pad, dil in (('cr1', 3, d0), ('cr2', 2, d1), ('cr3', 1, d2),
                           ('cr4', 1, d2), ('cr5', 1, d2), ('cr6', 1, d2)):
        w, b = p[name]
        t = conv2d_cm(cat, w, b, H=H, W=W, padding=pad, dilation=dil, relu=True)
        cat = jnp.concatenate([cat, t], axis=1)

    _t = conv2d_cm(cat, *p['cs'], H=H, W=W, padding=0)                      # 1x1 squeeze

    # DCT-domain branch
    _ty = conv2d_cm(_t, *p['c1'], H=H, W=W, padding=1, clamp=(-0.5, 0.5))   # conv_1 + clamp
    _tc = conv2d_cm(_t, *p['c2'], H=H, W=W, padding=2, dilation=2)          # conv_2
    ty_w = get_weight(_t, p['gwy'], H, W)
    _ty = implicit_trans(_ty, ty_w, *p['it1'])
    tc_w = get_weight(_t, p['gwc'], H, W)
    _tc = implicit_trans(_tc, tc_w, *p['it2'])

    # Pixel-domain branch: 16 x ResidualBlockNoBN (identity add fused into 2nd conv)
    def rb_body(h, blk):
        w1, b1, w2, b2 = blk
        h1 = conv2d_cm(h, w1, b1, H=H, W=W, padding=1, relu=True)
        return conv2d_cm(h1, w2, b2, H=H, W=W, padding=1, residual=h), None

    h, _ = lax.scan(rb_body, _t, (p['rb_w1'], p['rb_b1'], p['rb_w2'], p['rb_b2']))
    _tp = conv2d_cm(h, *p['c3'], H=H, W=W, padding=1)                       # conv_3

    # conv_4(cat(_ty, _tc)) + _tp, fused via the residual input
    _td_tp = conv2d_cm(jnp.concatenate([_ty, _tc], axis=1), *p['c4'],
                       H=H, W=W, padding=1, residual=_tp)
    y = x + 0.1 * _td_tp
    return y.reshape(N, C, H, W)


def ref_dual_domain_block(x, p, dilation_rates=(3, 2, 1)):
    """Pure-JAX (lax.conv, HIGHEST precision) reference of the PyTorch forward."""
    P = lax.Precision.HIGHEST

    def conv(v, wb, pad, dil=1, stride=1):
        w, b = wb
        o = lax.conv_general_dilated(v, w, (stride, stride), [(pad, pad)] * 2,
                                     rhs_dilation=(dil, dil),
                                     dimension_numbers=("NCHW", "OIHW", "NCHW"),
                                     precision=P)
        return o + b[None, :, None, None]

    relu = lambda v: jnp.maximum(v, 0.0)
    d0, d1, d2 = dilation_rates

    cat = x
    for name, pad, dil in (('cr1', 3, d0), ('cr2', 2, d1), ('cr3', 1, d2),
                           ('cr4', 1, d2), ('cr5', 1, d2), ('cr6', 1, d2)):
        t = relu(conv(cat, p[name], pad, dil))
        cat = jnp.concatenate([cat, t], axis=1)
    _t = conv(cat, p['cs'], 0)

    _ty = jnp.clip(conv(_t, p['c1'], 1), -0.5, 0.5)
    _tc = conv(_t, p['c2'], 2, 2)

    def gw(v, gp):
        z = conv(v, (gp['dw'], gp['db']), 1, 1, stride=2)
        y = jnp.mean(z, axis=(2, 3))
        for k in ('w1', 'w2', 'w3', 'w4'):
            y = jnp.maximum(jnp.dot(y, gp[k].T, precision=P), 0.0)
        return y

    def it(v, wvec, fp):
        factor, bias = fp
        table = _jpeg_table() * factor + bias
        kmat = (_dct_kernel() * table[:, None])[:, :, None, None]
        return lax.conv_general_dilated(v * wvec[:, :, None, None], kmat, (1, 1),
                                        [(0, 0)] * 2,
                                        dimension_numbers=("NCHW", "OIHW", "NCHW"),
                                        precision=P)

    _ty = it(_ty, gw(_t, p['gwy']), p['it1'])
    _tc = it(_tc, gw(_t, p['gwc']), p['it2'])

    h = _t
    for i in range(p['rb_w1'].shape[0]):
        h = h + conv(relu(conv(h, (p['rb_w1'][i], p['rb_b1'][i]), 1)),
                     (p['rb_w2'][i], p['rb_b2'][i]), 1)
    _tp = conv(h, p['c3'], 1)
    _td = conv(jnp.concatenate([_ty, _tc], axis=1), p['c4'], 1)
    return x + 0.1 * (_td + _tp)


# ----------------------------------------------------------------------------
if __name__ == "__main__":
    # DualDomainBlock(n_channels=64, n_pyramid_cells=(3, 2, 1), n_pyramid_channels=64)
    # (n_channels is fixed to 64 by GetWeight / ImplicitTrans in the reference code.)
    N, C, H, W = 2, 64, 16, 16
    dilation_rates = (3, 2, 1)

    keys = iter(jax.random.split(jax.random.PRNGKey(0), 64))

    def conv_p(cout, cin, k):
        kw_, kb_ = jax.random.split(next(keys))
        bound = 1.0 / math.sqrt(cin * k * k)
        w = jax.random.uniform(kw_, (cout, cin, k, k), minval=-bound, maxval=bound,
                               dtype=jnp.float32)
        b = jax.random.uniform(kb_, (cout,), minval=-bound, maxval=bound,
                               dtype=jnp.float32)
        return w, b

    def lin_p(cout, cin):
        bound = 1.0 / math.sqrt(cin)
        return jax.random.uniform(next(keys), (cout, cin), minval=-bound, maxval=bound,
                                  dtype=jnp.float32)

    def gw_p():
        dw, db = conv_p(C, C, 3)
        return {'dw': dw, 'db': db,
                'w1': lin_p(C * 8, C), 'w2': lin_p(C * 4, C * 8),
                'w3': lin_p(C * 2, C * 4), 'w4': lin_p(C, C * 2)}

    rb = [(conv_p(C, C, 3), conv_p(C, C, 3)) for _ in range(16)]
    params = {
        'cr1': conv_p(C, C, 3), 'cr2': conv_p(C, 2 * C, 3), 'cr3': conv_p(C, 3 * C, 3),
        'cr4': conv_p(C, 4 * C, 3), 'cr5': conv_p(C, 5 * C, 3), 'cr6': conv_p(C, 6 * C, 3),
        'cs': conv_p(C, 7 * C, 1),
        'c1': conv_p(C, C, 3), 'c2': conv_p(C, C, 3),
        'c3': conv_p(C, C, 3), 'c4': conv_p(C, 2 * C, 3),
        'gwy': gw_p(), 'gwc': gw_p(),
        'it1': (jnp.ones((C,), jnp.float32), jnp.zeros((C,), jnp.float32)),
        'it2': (jnp.ones((C,), jnp.float32), jnp.zeros((C,), jnp.float32)),
        'rb_w1': jnp.stack([blk[0][0] for blk in rb]),
        'rb_b1': jnp.stack([blk[0][1] for blk in rb]),
        'rb_w2': jnp.stack([blk[1][0] for blk in rb]),
        'rb_b2': jnp.stack([blk[1][1] for blk in rb]),
    }

    x = jax.random.normal(next(keys), (N, C, H, W), dtype=jnp.float32)

    _roll_like_jnp()   # probe pltpu.roll's rotation convention once, outside jit

    fwd = jax.jit(dual_domain_block, static_argnames="dilation_rates")
    out = jax.block_until_ready(fwd(x, params, dilation_rates=dilation_rates))

    ref = jax.block_until_ready(
        jax.jit(ref_dual_domain_block, static_argnames="dilation_rates")(
            x, params, dilation_rates=dilation_rates))

    assert out.shape == (N, C, H, W)
    assert float(jnp.max(jnp.abs(out - ref))) < 5e-3
    print("KERNEL_OK")
</pallas_src>

<mosaic_0001>
module attributes {stable_mosaic.version = 11 : i64} {
  func.func @probe(%arg0: memref<8x128xf32, #tpu.memory_space<vmem>>, %arg1: memref<8x128xf32, #tpu.memory_space<vmem>>) attributes {dimension_semantics = [], scalar_prefetch = 0 : i64, scratch_operands = 0 : i64, tpu.core_type = #tpu.core_type<tc>} {
    %c0 = arith.constant 0 : index
    %c0_0 = arith.constant 0 : index
    %0 = vector.load %arg0[%c0, %c0_0] : memref<8x128xf32, #tpu.memory_space<vmem>>, vector<8x128xf32>
    %c1_i32 = arith.constant 1 : i32
    %1 = tpu.dynamic_rotate %0 by %c1_i32 dim 1 : vector<8x128xf32>, i32 -> vector<8x128xf32>
    %c0_1 = arith.constant 0 : index
    %c0_2 = arith.constant 0 : index
    %2 = vector.load %arg1[%c0_1, %c0_2] : memref<8x128xf32, #tpu.memory_space<vmem>>, vector<8x128xf32>
    tpu.vector_store %arg1[%c0_1, %c0_2], %1 {strides = array<i32>} : memref<8x128xf32, #tpu.memory_space<vmem>>, vector<8x128xf32>,
    return
  }
}

</mosaic_0001>

<bundles_post_ra>
// kernel: tpu_custom_call.1
= control target key start
LH: loop header
LB: loop body
LE: loop exit
PB: predicated region body
PF: predicated region fallthrough
CT: control target
= control target key end

     0   :  { %6 = vsyncpa [#allocation3], 0  ;;  %s128_s0 = inlined_call_operand.hbm [shape: f32[8,128], index: 0, kind: input, shape index: {}]   ;;  %s129_s1 = inlined_call_operand.hbm [shape: f32[8,128], index: 1, kind: output, shape index: {}]  }
   0x1   :  { %7 = vsyncpa [#allocation4], 0  ;;  %s91_s6 = smov [#allocation2]   ;;  %s43_s10 = scalar_lea.hbm %s128_s0, 128 }
   0x2   :  { %s14_s7 = sshll.u32 %s91_s6, 4  ;;  %p44_p0 = scmp.ne.s32.totalorder %s128_s0, %s43_s10  ;;  %s15_s7 = int_to_ptr.vmem [resolvable:$true] %s14_s7 }
   0x3   :  { %p47_p1 = scmp.lt.u32.totalorder %s43_s10, %s128_s0 }
   0x5   :  { %p49_p2 = pnand %p47_p1, %p44_p0 }
   0x7   :  { %52 = shalt.err (!%p49_p2)
}
   0x8   :  { %s53_s15 = scalar_lea.vmem %s15_s7, 128  ;;  %p58_p4 = scmp.lt.s32.totalorder %s15_s7, %s15_s7 }
   0x9   :  { %p54_p3 = scmp.ne.s32.totalorder %s15_s7, %s53_s15  ;;  %p59_p5 = scmp.lt.s32.totalorder %s53_s15, %s53_s15 }
   0xb   :  { %p60_p6 = por %p59_p5, %p58_p4 }
   0xd   :  { %p61_p7 = pnand %p60_p6, %p54_p3 }
   0xf   :  { %64 = shalt.err (!%p61_p7)
}
  0x10   :  { %17 = dma.hbm_to_vmem [thread:$0]  %s128_s0, 128, %s15_s7, [#allocation3]  }
  0x11   :  { %87 = dma.done.wait [#allocation3], 128  }
  0x12   :  { %88 = vsyncadd [#allocation3], 4294967168  ;;  %v21_v0 = vld [vmem:[#allocation2] sm:$0xff]  ;;  %s92_s18 = smov 1   ;;  %s93_s19 = smov [#allocation5]  }
  0x13   :  { %22 = vrot.lane.b32.xlu0 %v21_v0, %s92_s18  ;;  %s31_s20 = sshll.u32 %s93_s19, 4  ;;  %s32_s20 = int_to_ptr.vmem [resolvable:$true] %s31_s20 }
  0x14   :  { %s65_s21 = scalar_lea.vmem %s32_s20, 128  ;;  %p70_p9 = scmp.lt.s32.totalorder %s32_s20, %s32_s20 }
  0x15   :  { %p66_p8 = scmp.ne.s32.totalorder %s32_s20, %s65_s21  ;;  %p71_p10 = scmp.lt.s32.totalorder %s65_s21, %s65_s21 }
  0x17   :  { %p72_p11 = por %p71_p10, %p70_p9 }
  0x19   :  { %p73_p12 = pnand %p72_p11, %p66_p8 }
  0x85   :  { %v23_v1 = vpop.permute.xlu0 %22 }
  0x86   :  { %24 = vst [vmem:[#allocation5] sm:$0xff] %v23_v1 }
  0x87   :  { %76 = shalt.err (!%p73_p12)
}
  0x88   :  { %s77_s0 = scalar_lea.hbm %s129_s1, 128 }
  0x89   :  { %p78_p13 = scmp.ne.s32.totalorder %s129_s1, %s77_s0  ;;  %p81_p0 = scmp.lt.u32.totalorder %s77_s0, %s129_s1 }
  0x8b   :  { %p83_p1 = pnand %p81_p0, %p78_p13 }
  0x8d   :  { %86 = shalt.err (!%p83_p1)
}
  0x8e   :  { %34 = dma.vmem_to_hbm [thread:$0]  %s32_s20, 128, %s129_s1, [#allocation4]  }
  0x8f   :  { %89 = dma.done.wait [#allocation4], 128  }
  0x90   :  { %90 = vsyncadd [#allocation4], 4294967168 }
  0x91   :  { %38 = vsyncpa [#allocation3], 1 }
  0x92   :  { %39 = vsyncpa [#allocation4], 1 }

</bundles_post_ra>
